<compile_context>
chip_gen: v7x
topology: tpu7x:2x2x1
jax: 0.10.0
libtpu: 0.0.40
codegen_flags: <defaults>
</compile_context>

<pallas_src>
import functools

import jax
import jax.numpy as jnp
from jax.experimental import pallas as pl
from jax.experimental.pallas import tpu as pltpu


def _round_up(x, m):
    return ((x + m - 1) // m) * m


def _chip_defaults():
    """Derive (vmem_limit_bytes, default_tm) from the TPU generation."""
    cap = 128 * 1024 * 1024
    try:
        info = pltpu.get_tpu_info()
        cap = int(getattr(info, "vmem_capacity_bytes", cap))
    except Exception:
        pass
    vmem_limit = (cap * 3) // 4          # leave headroom for Mosaic internal scratch
    default_tm = 256 if cap <= 64 * 1024 * 1024 else 512
    return vmem_limit, default_tm


_VMEM_LIMIT, _DEFAULT_TM = _chip_defaults()


def _const_spec(shape):
    """Full-array BlockSpec with constant index_map; single-buffered when supported."""
    idx = lambda i: (0,) * len(shape)
    try:
        return pl.BlockSpec(shape, idx, pipeline_mode=pl.Buffered(1))
    except TypeError:  # older BlockSpec without pipeline_mode kwarg
        return pl.BlockSpec(shape, idx)


def _layernorm(x, gamma, beta, eps=1e-12):
    # BertLayerNorm: biased variance over the last (hidden) dim.
    u = jnp.mean(x, axis=-1, keepdims=True)
    s = jnp.mean((x - u) * (x - u), axis=-1, keepdims=True)
    return (x - u) * jax.lax.rsqrt(s + eps) * gamma + beta


def bert_output_kernel(h1_ref, h2_ref, in1_ref, in2_ref,
                       w1_ref, w2_ref, pv_ref,
                       o1_ref, o2_ref):
    # Packed parameter slab rows:
    #   0:b1  1:b2  2:ln1_g  3:ln1_b  4:ln2_g  5:ln2_b  6:cw1  7:cw2
    b1, b2 = pv_ref[0:1, :], pv_ref[1:2, :]
    g1, be1 = pv_ref[2:3, :], pv_ref[3:4, :]
    g2, be2 = pv_ref[4:5, :], pv_ref[5:6, :]
    cw1, cw2 = pv_ref[6:7, :], pv_ref[7:8, :]

    # Branch 1 fully, then branch 2: keeps only one (tm, H) f32 dense output live at a
    # time, reducing peak Mosaic scratch / vreg pressure.  h refs and weights are bf16
    # (cast in the wrapper); MXU accumulates in f32.
    d1 = jnp.dot(h1_ref[...], w1_ref[...], preferred_element_type=jnp.float32) + b1
    hs1 = _layernorm(d1 + in1_ref[...].astype(jnp.float32), g1, be1)

    d2 = jnp.dot(h2_ref[...], w2_ref[...], preferred_element_type=jnp.float32) + b2
    hs2 = _layernorm(d2 + in2_ref[...].astype(jnp.float32), g2, be2)

    # channel_w scaling + cross-branch addition.
    o1_ref[...] = (hs1 + cw2 * hs2).astype(o1_ref.dtype)
    o2_ref[...] = (hs2 + cw1 * hs1).astype(o2_ref.dtype)


@functools.partial(jax.jit, static_argnames=("tm",))
def bert_output(h1, h2, in1, in2, params, *, tm=None):
    """h1,h2: (B,S,I); in1,in2: (B,S,H). Returns [(B,S,H), (B,S,H)]."""
    B, S, I = h1.shape
    H = in1.shape[-1]
    N = B * S
    if tm is None:
        tm = _DEFAULT_TM

    # Row-tile size: large to fill MXU rows, never larger than the 8-aligned row count,
    # and (when possible) small enough that the grid has >= 2 steps so the "parallel"
    # axis can shard across the two TensorCores of a v7x megacore.
    tm_eff = min(tm, _round_up(N, 8))
    if N > 8 and pl.cdiv(N, tm_eff) < 2:
        tm_eff = _round_up(pl.cdiv(N, 2), 8)
    grid_m = pl.cdiv(N, tm_eff)   # ragged last block is fine: LayerNorm is row-wise and
                                  # out-of-range rows are never written back.

    # bf16 activations for the GEMM inputs (halves HBM traffic and VMEM double-buffers);
    # residuals/outputs stay in the caller's dtype.
    h1f = h1.reshape(N, I).astype(jnp.bfloat16)
    h2f = h2.reshape(N, I).astype(jnp.bfloat16)
    in1f = in1.reshape(N, H)
    in2f = in2.reshape(N, H)

    w1 = params["w1"].astype(jnp.bfloat16)
    w2 = params["w2"].astype(jnp.bfloat16)

    # Pack the eight per-hidden-channel parameter vectors into a single (8, H) slab.
    pvec = jnp.stack(
        [params["b1"], params["b2"],
         params["ln1_g"], params["ln1_b"],
         params["ln2_g"], params["ln2_b"],
         params["cw1"], params["cw2"]], axis=0).astype(jnp.float32)

    row_spec_i = pl.BlockSpec((tm_eff, I), lambda i: (i, 0))
    row_spec_h = pl.BlockSpec((tm_eff, H), lambda i: (i, 0))
    w_spec = _const_spec((I, H))
    pv_spec = _const_spec((8, H))

    cost = pl.CostEstimate(
        flops=2 * 2 * N * I * H,                       # two GEMMs
        transcendentals=2 * N,                         # one rsqrt per row per branch
        bytes_accessed=(2 * N * I * 2                  # h1, h2 (bf16)
                        + 2 * N * H * in1f.dtype.itemsize  # residuals
                        + 2 * N * H * in1f.dtype.itemsize  # outputs
                        + 2 * I * H * 2                # weights (bf16)
                        + 8 * H * 4))                  # packed params

    out1f, out2f = pl.pallas_call(
        bert_output_kernel,
        out_shape=(jax.ShapeDtypeStruct((N, H), in1.dtype),
                   jax.ShapeDtypeStruct((N, H), in2.dtype)),
        grid_spec=pltpu.PrefetchScalarGridSpec(
            num_scalar_prefetch=0,
            grid=(grid_m,),
            in_specs=[row_spec_i, row_spec_i, row_spec_h, row_spec_h,
                      w_spec, w_spec, pv_spec],
            out_specs=[row_spec_h, row_spec_h],
        ),
        compiler_params=pltpu.CompilerParams(
            dimension_semantics=("parallel",),
            vmem_limit_bytes=_VMEM_LIMIT),
        cost_estimate=cost,
    )(h1f, h2f, in1f, in2f, w1, w2, pvec)

    return [out1f.reshape(B, S, H), out2f.reshape(B, S, H)]


def _reference(h1, h2, in1, in2, params):
    d1 = h1 @ params["w1"] + params["b1"]
    d2 = h2 @ params["w2"] + params["b2"]
    hs1 = _layernorm(d1 + in1, params["ln1_g"], params["ln1_b"])
    hs2 = _layernorm(d2 + in2, params["ln2_g"], params["ln2_b"])
    res1 = params["cw1"] * hs1
    res2 = params["cw2"] * hs2
    return [hs1 + res2, hs2 + res1]


if __name__ == "__main__":
    # small config: hidden=32, intermediate=64, batch=2, seq=8
    B, S, H, I = 2, 8, 32, 64
    key = jax.random.PRNGKey(0)
    ks = jax.random.split(key, 12)

    h1 = jax.random.normal(ks[0], (B, S, I), jnp.float32)
    h2 = jax.random.normal(ks[1], (B, S, I), jnp.float32)
    in1 = jax.random.normal(ks[2], (B, S, H), jnp.float32)
    in2 = jax.random.normal(ks[3], (B, S, H), jnp.float32)

    params = {
        # QuantizeLinear(intermediate_size -> hidden_size): weight (I, H), bias (H,)
        "w1": jax.random.normal(ks[4], (I, H), jnp.float32) * 0.02,
        "b1": jax.random.normal(ks[5], (H,), jnp.float32) * 0.02,
        "w2": jax.random.normal(ks[6], (I, H), jnp.float32) * 0.02,
        "b2": jax.random.normal(ks[7], (H,), jnp.float32) * 0.02,
        # BertLayerNorm params
        "ln1_g": jnp.ones((H,), jnp.float32),
        "ln1_b": jnp.zeros((H,), jnp.float32),
        "ln2_g": jnp.ones((H,), jnp.float32),
        "ln2_b": jnp.zeros((H,), jnp.float32),
        # channel_w: torch.rand(1,1,H) * 0.1  -> uniform[0, 0.1)
        "cw1": jax.random.uniform(ks[8], (H,), jnp.float32) * 0.1,
        "cw2": jax.random.uniform(ks[9], (H,), jnp.float32) * 0.1,
    }

    out1, out2 = bert_output(h1, h2, in1, in2, params)
    jax.block_until_ready((out1, out2))

    ref1, ref2 = _reference(h1, h2, in1, in2, params)
    # bf16 MXU operands vs f32 reference -> loose tolerance (intentional numeric contract).
    assert jnp.allclose(out1, ref1, atol=2e-2, rtol=2e-2)
    assert jnp.allclose(out2, ref2, atol=2e-2, rtol=2e-2)

    print("KERNEL_OK")
</pallas_src>

<mosaic_0001>
module attributes {stable_mosaic.version = 11 : i64} {
  func.func @bert_output_kernel(%arg0: i32, %arg1: memref<8x64xbf16, #tpu.memory_space<vmem>>, %arg2: memref<8x64xbf16, #tpu.memory_space<vmem>>, %arg3: memref<8x32xf32, #tpu.memory_space<vmem>>, %arg4: memref<8x32xf32, #tpu.memory_space<vmem>>, %arg5: memref<64x32xbf16, #tpu.memory_space<vmem>>, %arg6: memref<64x32xbf16, #tpu.memory_space<vmem>>, %arg7: memref<8x32xf32, #tpu.memory_space<vmem>>, %arg8: memref<8x32xf32, #tpu.memory_space<vmem>>, %arg9: memref<8x32xf32, #tpu.memory_space<vmem>>) attributes {dimension_semantics = [#tpu.dimension_semantics<parallel>], iteration_bounds = array<i64: 2>, scalar_prefetch = 0 : i64, scratch_operands = 0 : i64, tpu.core_type = #tpu.core_type<tc>, window_params = [{transform_indices = @transform_0, window_bounds = array<i64: 8, 64>}, {transform_indices = @transform_1, window_bounds = array<i64: 8, 64>}, {transform_indices = @transform_2, window_bounds = array<i64: 8, 32>}, {transform_indices = @transform_3, window_bounds = array<i64: 8, 32>}, {pipeline_mode = #tpu.pipeline_mode<synchronous>, transform_indices = @transform_4, window_bounds = array<i64: 64, 32>}, {pipeline_mode = #tpu.pipeline_mode<synchronous>, transform_indices = @transform_5, window_bounds = array<i64: 64, 32>}, {pipeline_mode = #tpu.pipeline_mode<synchronous>, transform_indices = @transform_6, window_bounds = array<i64: 8, 32>}, {transform_indices = @transform_7, window_bounds = array<i64: 8, 32>}, {transform_indices = @transform_8, window_bounds = array<i64: 8, 32>}]} {
    %c0 = arith.constant 0 : index
    %c0_0 = arith.constant 0 : index
    %0 = vector.load %arg7[%c0, %c0_0] : memref<8x32xf32, #tpu.memory_space<vmem>>, vector<1x32xf32>
    %c1 = arith.constant 1 : index
    %c0_1 = arith.constant 0 : index
    %1 = vector.load %arg7[%c1, %c0_1] : memref<8x32xf32, #tpu.memory_space<vmem>>, vector<1x32xf32>
    %c2 = arith.constant 2 : index
    %c0_2 = arith.constant 0 : index
    %2 = vector.load %arg7[%c2, %c0_2] : memref<8x32xf32, #tpu.memory_space<vmem>>, vector<1x32xf32>
    %c3 = arith.constant 3 : index
    %c0_3 = arith.constant 0 : index
    %3 = vector.load %arg7[%c3, %c0_3] : memref<8x32xf32, #tpu.memory_space<vmem>>, vector<1x32xf32>
    %c4 = arith.constant 4 : index
    %c0_4 = arith.constant 0 : index
    %4 = vector.load %arg7[%c4, %c0_4] : memref<8x32xf32, #tpu.memory_space<vmem>>, vector<1x32xf32>
    %c5 = arith.constant 5 : index
    %c0_5 = arith.constant 0 : index
    %5 = vector.load %arg7[%c5, %c0_5] : memref<8x32xf32, #tpu.memory_space<vmem>>, vector<1x32xf32>
    %c6 = arith.constant 6 : index
    %c0_6 = arith.constant 0 : index
    %6 = vector.load %arg7[%c6, %c0_6] : memref<8x32xf32, #tpu.memory_space<vmem>>, vector<1x32xf32>
    %c7 = arith.constant 7 : index
    %c0_7 = arith.constant 0 : index
    %7 = vector.load %arg7[%c7, %c0_7] : memref<8x32xf32, #tpu.memory_space<vmem>>, vector<1x32xf32>
    %c0_8 = arith.constant 0 : index
    %c0_9 = arith.constant 0 : index
    %8 = vector.load %arg1[%c0_8, %c0_9] : memref<8x64xbf16, #tpu.memory_space<vmem>>, vector<8x64xbf16>
    %c0_10 = arith.constant 0 : index
    %c0_11 = arith.constant 0 : index
    %9 = vector.load %arg5[%c0_10, %c0_11] : memref<64x32xbf16, #tpu.memory_space<vmem>>, vector<64x32xbf16>
    %cst = arith.constant dense<0.000000e+00> : vector<8x32xf32>
    %10 = tpu.matmul %8, %9, %cst {dimension_numbers = #tpu.dot_dimension_numbers<[1], [0], [0], [1], [0, 0, 1, 1], [], []>} : vector<8x64xbf16>, vector<64x32xbf16>, vector<8x32xf32> -> vector<8x32xf32>
    %11 = vector.broadcast %0 : vector<1x32xf32> to vector<8x32xf32>
    %12 = arith.addf %10, %11 : vector<8x32xf32>
    %c0_12 = arith.constant 0 : index
    %c0_13 = arith.constant 0 : index
    %13 = vector.load %arg3[%c0_12, %c0_13] : memref<8x32xf32, #tpu.memory_space<vmem>>, vector<8x32xf32>
    %14 = arith.addf %12, %13 : vector<8x32xf32>
    %cst_14 = arith.constant dense<0.000000e+00> : vector<8xf32>
    %15 = vector.multi_reduction <add>, %14, %cst_14 [1] : vector<8x32xf32> to vector<8xf32>
    %16 = vector.shape_cast %15 : vector<8xf32> to vector<8x1xf32>
    %cst_15 = arith.constant 3.200000e+01 : f32
    %17 = vector.broadcast %cst_15 : f32 to vector<8x1xf32>
    %18 = arith.divf %16, %17 : vector<8x1xf32>
    %19 = vector.broadcast %18 : vector<8x1xf32> to vector<8x32xf32>
    %20 = arith.subf %14, %19 : vector<8x32xf32>
    %21 = vector.broadcast %18 : vector<8x1xf32> to vector<8x32xf32>
    %22 = arith.subf %14, %21 : vector<8x32xf32>
    %23 = arith.mulf %20, %22 : vector<8x32xf32>
    %cst_16 = arith.constant dense<0.000000e+00> : vector<8xf32>
    %24 = vector.multi_reduction <add>, %23, %cst_16 [1] : vector<8x32xf32> to vector<8xf32>
    %25 = vector.shape_cast %24 : vector<8xf32> to vector<8x1xf32>
    %cst_17 = arith.constant 3.200000e+01 : f32
    %26 = vector.broadcast %cst_17 : f32 to vector<8x1xf32>
    %27 = arith.divf %25, %26 : vector<8x1xf32>
    %28 = vector.broadcast %18 : vector<8x1xf32> to vector<8x32xf32>
    %29 = arith.subf %14, %28 : vector<8x32xf32>
    %cst_18 = arith.constant 9.99999996E-13 : f32
    %30 = vector.broadcast %cst_18 : f32 to vector<8x1xf32>
    %31 = arith.addf %27, %30 : vector<8x1xf32>
    %32 = math.rsqrt %31 : vector<8x1xf32>
    %33 = vector.broadcast %32 : vector<8x1xf32> to vector<8x32xf32>
    %34 = arith.mulf %29, %33 : vector<8x32xf32>
    %35 = vector.broadcast %2 : vector<1x32xf32> to vector<8x32xf32>
    %36 = arith.mulf %34, %35 : vector<8x32xf32>
    %37 = vector.broadcast %3 : vector<1x32xf32> to vector<8x32xf32>
    %38 = arith.addf %36, %37 : vector<8x32xf32>
    %c0_19 = arith.constant 0 : index
    %c0_20 = arith.constant 0 : index
    %39 = vector.load %arg2[%c0_19, %c0_20] : memref<8x64xbf16, #tpu.memory_space<vmem>>, vector<8x64xbf16>
    %c0_21 = arith.constant 0 : index
    %c0_22 = arith.constant 0 : index
    %40 = vector.load %arg6[%c0_21, %c0_22] : memref<64x32xbf16, #tpu.memory_space<vmem>>, vector<64x32xbf16>
    %cst_23 = arith.constant dense<0.000000e+00> : vector<8x32xf32>
    %41 = tpu.matmul %39, %40, %cst_23 {dimension_numbers = #tpu.dot_dimension_numbers<[1], [0], [0], [1], [0, 0, 1, 1], [], []>} : vector<8x64xbf16>, vector<64x32xbf16>, vector<8x32xf32> -> vector<8x32xf32>
    %42 = vector.broadcast %1 : vector<1x32xf32> to vector<8x32xf32>
    %43 = arith.addf %41, %42 : vector<8x32xf32>
    %c0_24 = arith.constant 0 : index
    %c0_25 = arith.constant 0 : index
    %44 = vector.load %arg4[%c0_24, %c0_25] : memref<8x32xf32, #tpu.memory_space<vmem>>, vector<8x32xf32>
    %45 = arith.addf %43, %44 : vector<8x32xf32>
    %cst_26 = arith.constant dense<0.000000e+00> : vector<8xf32>
    %46 = vector.multi_reduction <add>, %45, %cst_26 [1] : vector<8x32xf32> to vector<8xf32>
    %47 = vector.shape_cast %46 : vector<8xf32> to vector<8x1xf32>
    %cst_27 = arith.constant 3.200000e+01 : f32
    %48 = vector.broadcast %cst_27 : f32 to vector<8x1xf32>
    %49 = arith.divf %47, %48 : vector<8x1xf32>
    %50 = vector.broadcast %49 : vector<8x1xf32> to vector<8x32xf32>
    %51 = arith.subf %45, %50 : vector<8x32xf32>
    %52 = vector.broadcast %49 : vector<8x1xf32> to vector<8x32xf32>
    %53 = arith.subf %45, %52 : vector<8x32xf32>
    %54 = arith.mulf %51, %53 : vector<8x32xf32>
    %cst_28 = arith.constant dense<0.000000e+00> : vector<8xf32>
    %55 = vector.multi_reduction <add>, %54, %cst_28 [1] : vector<8x32xf32> to vector<8xf32>
    %56 = vector.shape_cast %55 : vector<8xf32> to vector<8x1xf32>
    %cst_29 = arith.constant 3.200000e+01 : f32
    %57 = vector.broadcast %cst_29 : f32 to vector<8x1xf32>
    %58 = arith.divf %56, %57 : vector<8x1xf32>
    %59 = vector.broadcast %49 : vector<8x1xf32> to vector<8x32xf32>
    %60 = arith.subf %45, %59 : vector<8x32xf32>
    %cst_30 = arith.constant 9.99999996E-13 : f32
    %61 = vector.broadcast %cst_30 : f32 to vector<8x1xf32>
    %62 = arith.addf %58, %61 : vector<8x1xf32>
    %63 = math.rsqrt %62 : vector<8x1xf32>
    %64 = vector.broadcast %63 : vector<8x1xf32> to vector<8x32xf32>
    %65 = arith.mulf %60, %64 : vector<8x32xf32>
    %66 = vector.broadcast %4 : vector<1x32xf32> to vector<8x32xf32>
    %67 = arith.mulf %65, %66 : vector<8x32xf32>
    %68 = vector.broadcast %5 : vector<1x32xf32> to vector<8x32xf32>
    %69 = arith.addf %67, %68 : vector<8x32xf32>
    %70 = vector.broadcast %7 : vector<1x32xf32> to vector<8x32xf32>
    %71 = arith.mulf %70, %69 : vector<8x32xf32>
    %72 = arith.addf %38, %71 : vector<8x32xf32>
    %c0_31 = arith.constant 0 : index
    %c0_32 = arith.constant 0 : index
    %73 = vector.load %arg8[%c0_31, %c0_32] : memref<8x32xf32, #tpu.memory_space<vmem>>, vector<8x32xf32>
    tpu.vector_store %arg8[%c0_31, %c0_32], %72 {strides = array<i32>} : memref<8x32xf32, #tpu.memory_space<vmem>>, vector<8x32xf32>,
    %74 = vector.broadcast %6 : vector<1x32xf32> to vector<8x32xf32>
    %75 = arith.mulf %74, %38 : vector<8x32xf32>
    %76 = arith.addf %69, %75 : vector<8x32xf32>
    %c0_33 = arith.constant 0 : index
    %c0_34 = arith.constant 0 : index
    %77 = vector.load %arg9[%c0_33, %c0_34] : memref<8x32xf32, #tpu.memory_space<vmem>>, vector<8x32xf32>
    tpu.vector_store %arg9[%c0_33, %c0_34], %76 {strides = array<i32>} : memref<8x32xf32, #tpu.memory_space<vmem>>, vector<8x32xf32>,
    return
  }
  func.func @transform_0(%arg0: i32) -> (i32, i32) {
    %c0_i32 = arith.constant 0 : i32
    %c0_i32_0 = arith.constant 0 : i32
    return %arg0, %c0_i32 : i32, i32
  }
  func.func @transform_1(%arg0: i32) -> (i32, i32) {
    %c0_i32 = arith.constant 0 : i32
    %c0_i32_0 = arith.constant 0 : i32
    return %arg0, %c0_i32 : i32, i32
  }
  func.func @transform_2(%arg0: i32) -> (i32, i32) {
    %c0_i32 = arith.constant 0 : i32
    %c0_i32_0 = arith.constant 0 : i32
    return %arg0, %c0_i32 : i32, i32
  }
  func.func @transform_3(%arg0: i32) -> (i32, i32) {
    %c0_i32 = arith.constant 0 : i32
    %c0_i32_0 = arith.constant 0 : i32
    return %arg0, %c0_i32 : i32, i32
  }
  func.func @transform_4(%arg0: i32) -> (i32, i32) {
    %c0_i32 = arith.constant 0 : i32
    %c0_i32_0 = arith.constant 0 : i32
    %c0_i32_1 = arith.constant 0 : i32
    return %c0_i32, %c0_i32_0 : i32, i32
  }
  func.func @transform_5(%arg0: i32) -> (i32, i32) {
    %c0_i32 = arith.constant 0 : i32
    %c0_i32_0 = arith.constant 0 : i32
    %c0_i32_1 = arith.constant 0 : i32
    return %c0_i32, %c0_i32_0 : i32, i32
  }
  func.func @transform_6(%arg0: i32) -> (i32, i32) {
    %c0_i32 = arith.constant 0 : i32
    %c0_i32_0 = arith.constant 0 : i32
    %c0_i32_1 = arith.constant 0 : i32
    return %c0_i32, %c0_i32_0 : i32, i32
  }
  func.func @transform_7(%arg0: i32) -> (i32, i32) {
    %c0_i32 = arith.constant 0 : i32
    %c0_i32_0 = arith.constant 0 : i32
    return %arg0, %c0_i32 : i32, i32
  }
  func.func @transform_8(%arg0: i32) -> (i32, i32) {
    %c0_i32 = arith.constant 0 : i32
    %c0_i32_0 = arith.constant 0 : i32
    return %arg0, %c0_i32 : i32, i32
  }
}

</mosaic_0001>

<bundles_post_ra>
// kernel: bert_output.1
= control target key start
LH: loop header
LB: loop body
LE: loop exit
PB: predicated region body
PF: predicated region fallthrough
CT: control target
= control target key end

     0   :  { %s1939_s0 = inlined_call_operand.hbm [shape: bf16[16,64], index: 0, kind: input, shape index: {}]   ;;  %s1940_s1 = inlined_call_operand.hbm [shape: bf16[16,64], index: 1, kind: input, shape index: {}]   ;;  %s1941_s2 = inlined_call_operand.hbm [shape: f32[16,32], index: 2, kind: input, shape index: {}]   ;;  %s1942_s3 = inlined_call_operand.hbm [shape: f32[16,32], index: 3, kind: input, shape index: {}]   ;;  %s1943_s4 = inlined_call_operand.hbm [shape: bf16[64,32], index: 4, kind: input, shape index: {}]   ;;  %s1944_s5 = inlined_call_operand.hbm [shape: bf16[64,32], index: 5, kind: input, shape index: {}]   ;;  %s1945_s6 = inlined_call_operand.hbm [shape: f32[8,32], index: 6, kind: input, shape index: {}]   ;;  %s1946_s7 = inlined_call_operand.hbm [shape: f32[16,32], index: 7, kind: output, shape index: {0}]   ;;  %s1947_s8 = inlined_call_operand.hbm [shape: f32[16,32], index: 8, kind: output, shape index: {1}]  }
   0x1   :  { %1962 = sst [smem:[#allocation27_spill]] %s1940_s1 }
   0x2   :  { %1963 = sst [smem:[#allocation28_spill]] %s1943_s4 }
   0x3   :  { %1964 = sst [smem:[#allocation29_spill]] %s1944_s5 }
   0x4   :  { %14 = vsyncpa [#allocation3], 0 }
   0x5   :  { %16 = vsyncpa [#allocation3 + $0x1], 0 }
   0x6   :  { %17 = vsyncpa [#allocation6], 0 }
   0x7   :  { %19 = vsyncpa [#allocation6 + $0x1], 0 }
   0x8   :  { %20 = vsyncpa [#allocation9], 0 }
   0x9   :  { %22 = vsyncpa [#allocation9 + $0x1], 0 }
   0xa   :  { %23 = vsyncpa [#allocation12], 0 }
   0xb   :  { %24 = vsyncpa [#allocation4], 0 }
   0xc   :  { %26 = vsyncpa [#allocation4 + $0x1], 0 }
   0xd   :  { %27 = vsyncpa [#allocation16], 0 }
   0xe   :  { %29 = vsyncpa [#allocation16 + $0x1], 0  ;;  %s1518_s27 = smov 0   ;;  %s1520_s28 = smov 0  }
   0xf   :  { %s1522_s29 = smov 0   ;;  %s1524_s30 = smov 0  }
  0x10 LB: > { %1965 = sst [smem:[#allocation24_spill]] %s1454_s29  ;;  %s1539_s9 = sadd.s32 4294967295, %s1458_s30   ;;  %s1458_s30 = sphi %s1524_s30, %s2002_s30   ;;  %s1454_s29 = sphi %s1522_s29, %s1999_s29   ;;  %s1450_s28 = sphi %s1520_s28, %s2001_s28   ;;  %s1446_s27 = sphi %s1518_s27, %s2000_s27  }
  0x11   : > { %s945_s10 = sadd.s32 4294967294, %s1458_s30   ;;  %p55_p0 = scmp.ne.s32.totalorder %s1450_s28, %s1446_s27 }
  0x12   : > { %p1948_p1 = scmp.eq.s32.totalorder %s1539_s9, 0  ;;  %p226_p3 = scmp.eq.s32.totalorder %s945_s10, 1 }
  0x13   : > { %p946_p5 = scmp.ge.s32.totalorder %s1458_s30, 1  ;;  %p259_p7 = scmp.lt.s32.totalorder %s1458_s30, 3 }
  0x14   : > { %p1548_p4 = por %p1948_p1, %p55_p0  ;;  %p1553_p6 = por %p226_p3, %p55_p0 }
  0x15   : > { %p1558_p8 = pnand %p946_p5, %p259_p7  ;;  %s1460_s14 = smov [#allocation10]  }
  0x16   : > { %s1966_s11 = scalar_select %p1548_p4, 1, 0 }
  0x17   : > { %s1967_s12 = scalar_select %p1553_p6, 1, 0 }
  0x18   : > { %s1969_s13 = scalar_select %p1558_p8, 1, 0 }
  0x19   : > { %1968 = sst [smem:[#allocation25_spill]] %s1967_s12  ;;  %s271_s15 = sshll.u32 %s1460_s14, 4  ;;  %s1562_s15 = int_to_ptr.vmem [resolvable:$true] %s271_s15 }
  0x1a   : > { %p1051_p9 = pneg %p1558_p8  ;;  %s1461_s17 = smov [#allocation11]  }
  0x1b   : > { %s284_s18 = sshll.u32 %s1461_s17, 4  ;;  %s1971_s4 = sld [smem:[#allocation28_spill]]  ;;  %s1573_s18 = int_to_ptr.vmem [resolvable:$true] %s284_s18 }
  0x1c   : > { %p1569_p11 = pnand %p1051_p9, %p1948_p1 }
  0x1e   : > { %s1970_s16 = scalar_select %p1569_p11, 1, 0 }
  0x1f   : > { %p1583_p13 = pneg %p1569_p11 }
  0x21   : > { %s1140_s21 = scalar_lea.hbm %s1971_s4, 512 }
  0x22   : > { %p1141_p12 = scmp.ne.s32.totalorder %s1971_s4, %s1140_s21  ;;  %p1147_p5 = scmp.lt.u32.totalorder %s1140_s21, %s1971_s4 }
  0x23   : > { %s1972_s24 = scalar_select %p1583_p13, 1, 0 }
  0x24   : > { %p1143_p0 = pnand %p1583_p13, %p1141_p12 }
  0x26   : > { %p1144_p3 = pneg %p1143_p0 }
  0x28   : > { %p1149_p7 = pnand %p1147_p5, %p1144_p3 }
  0x2a   : > { %1152 = shalt.err (!%p1149_p7)
}
  0x2b   : > { %s1153_s10 = scalar_lea.vmem %s1562_s15, 512  ;;  %p1161_p2 = scmp.lt.s32.totalorder %s1562_s15, %s1562_s15 }
  0x2c   : > { %p1154_p9 = scmp.ne.s32.totalorder %s1562_s15, %s1153_s10  ;;  %p1162_p6 = scmp.lt.s32.totalorder %s1153_s10, %s1153_s10 }
  0x2e   : > { %p1156_p10 = pnand %p1154_p9, %p1583_p13  ;;  %p1163_p12 = por %p1162_p6, %p1161_p2 }
  0x30   : > { %p1157_p1 = pneg %p1156_p10 }
  0x32   : > { %p1164_p0 = pnand %p1163_p12, %p1157_p1 }
  0x34   : > { %1167 = shalt.err (!%p1164_p0)
}
  0x35   : > { %s1462_s14 = smov 64   ;;  %s1463_s17 = smov 4  }
  0x36   : > { %1054 = dma.hbm_to_vmem [thread:$0]  (!%p1569_p11), %s1971_s4, 512, %s1562_s15, [#allocation9], %s1462_s14, %s1462_s14, %s1463_s17  }
  0x37   : > { %s1973_s5 = sld [smem:[#allocation29_spill]] }
  0x3d   : > { %s1168_s23 = scalar_lea.hbm %s1973_s5, 512 }
  0x3e   : > { %p1169_p2 = scmp.ne.s32.totalorder %s1973_s5, %s1168_s23  ;;  %p1175_p10 = scmp.lt.u32.totalorder %s1168_s23, %s1973_s5 }
  0x40   : > { %p1171_p1 = pnand %p1169_p2, %p1583_p13 }
  0x42   : > { %p1172_p6 = pneg %p1171_p1 }
  0x44   : > { %p1177_p3 = pnand %p1175_p10, %p1172_p6 }
  0x46   : > { %1180 = shalt.err (!%p1177_p3)
}
  0x47   : > { %s1181_s15 = scalar_lea.vmem %s1573_s18, 512  ;;  %p1189_p12 = scmp.lt.s32.totalorder %s1573_s18, %s1573_s18 }
  0x48   : > { %p1182_p5 = scmp.ne.s32.totalorder %s1573_s18, %s1181_s15  ;;  %p1190_p0 = scmp.lt.s32.totalorder %s1181_s15, %s1181_s15 }
  0x4a   : > { %p1184_p7 = pnand %p1182_p5, %p1583_p13  ;;  %p1191_p2 = por %p1190_p0, %p1189_p12 }
  0x4c   : > { %p1185_p9 = pneg %p1184_p7 }
  0x4e   : > { %p1192_p1 = pnand %p1191_p2, %p1185_p9 }
  0x50   : > { %1195 = shalt.err (!%p1192_p1)
}
  0x51   : > { %1057 = dma.hbm_to_vmem [thread:$0]  (!%p1569_p11), %s1973_s5, 512, %s1573_s18, [#allocation12], %s1462_s14, %s1462_s14, %s1463_s17  }
  0x52   : > { %s1628_s20 = sadd.s32 1, %s1458_s30   ;;  %s42_s21 = sadd.s32 1, %s1454_s29 }
  0x53   : > { %s39_s22 = ssub.s32 %s1458_s30, %s1628_s20  ;;  %p49_p6 = scmp.ne.s32.totalorder %s1454_s29, %s1450_s28 }
  0x54   : > { %p40_p10 = scmp.eq.s32.totalorder %s39_s22, 0  ;;  %p50_p3 = scmp.eq.s32.totalorder %s1458_s30, 0 }
  0x55   : > { %p1974_p5 = scmp.eq.s32.totalorder %s1539_s9, 1  ;;  %p1084_p9 = scmp.lt.s32.totalorder %s1458_s30, 2 }
  0x56   : > { %s1644_s25 = scalar_select %p40_p10, %s1454_s29, %s42_s21  }
  0x57   : > { %p1638_p7 = por %p1974_p5, %p49_p6  ;;  %p51_p12 = por %p50_p3, %p49_p6 }
  0x58   : > { %1976 = sst [smem:[#allocation26_spill]] %s1644_s25  ;;  %s1647_s18 = sand.u32 1, %s1454_s29  }
  0x59   : > { %s1975_s23 = scalar_select %p1638_p7, 1, 0 }
  0x5a   : > { %s1950_s14 = sshll.u32 %s1647_s18, 2  ;;  %s1951_s17 = sshll.u32 %s1458_s30, 6 }
  0x5b   : > { %p1651_p0 = pnand %p1084_p9, %p51_p12  ;;  %s1954_s10 = sand.u32 1, %s1458_s30  }
  0x5c   : > { %s1978_s1 = sld [smem:[#allocation27_spill]]  ;;  %s331_s21 = scalar_lea.vmem [#allocation5], %s1950_s14 }
  0x5d   : > { %s1977_s26 = scalar_select %p1651_p0, 1, 0 }
  0x5e   : > { %s338_s22 = sshll.u32 %s331_s21, 4  ;;  %s1669_s4 = scalar_lea.sflag [#allocation6], %s1954_s10  ;;  %s1665_s22 = int_to_ptr.vmem [resolvable:$true] %s338_s22 }
  0x5f   : > { %p1675_p1 = pneg %p1651_p0 }
  0x62   : > { %s1661_s19 = scalar_lea.hbm %s1978_s1, %s1951_s17  ;;  %s1201_s21 = scalar_lea.hbm %s1978_s1, 128 }
  0x63   : > { %s1196_s5 = scalar_lea.hbm %s1661_s19, 64  ;;  %p1202_p3 = scmp.lt.u32.totalorder %s1661_s19, %s1978_s1 }
  0x64   : > { %p1197_p2 = scmp.ne.s32.totalorder %s1661_s19, %s1196_s5  ;;  %p1203_p5 = scmp.lt.u32.totalorder %s1201_s21, %s1196_s5 }
  0x65   : > { %p1205_p12 = scmp.lt.u32.totalorder %s1196_s5, %s1661_s19 }
  0x66   : > { %p1199_p6 = pnand %p1675_p1, %p1197_p2  ;;  %p1204_p9 = por %p1203_p5, %p1202_p3 }
  0x68   : > { %p1200_p10 = pneg %p1199_p6  ;;  %p1206_p7 = por %p1205_p12, %p1204_p9 }
  0x6a   : > { %p1207_p4 = pnand %p1206_p7, %p1200_p10 }
  0x6c   : > { %1210 = shalt.err (!%p1207_p4)
}
  0x6d   : > { %s1211_s10 = scalar_lea.vmem %s1665_s22, 64  ;;  %s1464_s15 = smov [#allocation5]  }
  0x6e   : > { %p1212_p2 = scmp.ne.s32.totalorder %s1665_s22, %s1211_s10  ;;  %s1216_s12 = sshll.u32 %s1464_s15, 4  ;;  %s1217_s12 = int_to_ptr.vmem [resolvable:$false] %s1216_s12 }
  0x6f   : > { %s1218_s14 = scalar_lea.vmem %s1217_s12, 128  ;;  %p1219_p11 = scmp.lt.s32.totalorder %s1665_s22, %s1217_s12 }
  0x70   : > { %p1214_p6 = pnand %p1212_p2, %p1675_p1  ;;  %p1220_p13 = scmp.lt.s32.totalorder %s1218_s14, %s1211_s10 }
  0x72   : > { %p1215_p8 = pneg %p1214_p6  ;;  %p1221_p3 = por %p1220_p13, %p1219_p11 }
  0x74   : > { %p1222_p5 = pnand %p1221_p3, %p1215_p8 }
  0x76   : > { %1225 = shalt.err (!%p1222_p5)
}
  0x77   : > { %1067 = dma.hbm_to_vmem [thread:$0]  (!%p1651_p0), %s1661_s19, 64, %s1665_s22, %s1669_s4  }
  0x78   : > { %s1465_s5 = smov [#allocation13]   ;;  %s1226_s15 = scalar_lea.hbm %s1945_s6, 128 }
  0x79   : > { %s298_s17 = sshll.u32 %s1465_s5, 4  ;;  %p1227_p4 = scmp.ne.s32.totalorder %s1945_s6, %s1226_s15  ;;  %s299_s17 = int_to_ptr.vmem [resolvable:$true] %s298_s17 }
  0x7a   : > { %p1980_p8 = scmp.ne.s32.totalorder %s1972_s24, 0  ;;  %p1233_p7 = scmp.lt.u32.totalorder %s1226_s15, %s1945_s6 }
  0x7c   : > { %p1229_p11 = pnand %p1227_p4, %p1980_p8 }
  0x7e   : > { %p1230_p13 = pneg %p1229_p11 }
  0x80   : > { %p1235_p10 = pnand %p1233_p7, %p1230_p13 }
  0x82   : > { %1238 = shalt.err (!%p1235_p10)
}
  0x83   : > { %s1239_s19 = scalar_lea.vmem %s299_s17, 128  ;;  %p1247_p6 = scmp.lt.s32.totalorder %s299_s17, %s299_s17 }
  0x84   : > { %p1240_p9 = scmp.ne.s32.totalorder %s299_s17, %s1239_s19  ;;  %p1248_p3 = scmp.lt.s32.totalorder %s1239_s19, %s1239_s19 }
  0x86   : > { %p1242_p12 = pnand %p1240_p9, %p1980_p8  ;;  %p1249_p5 = por %p1248_p3, %p1247_p6 }
  0x88   : > { %p1243_p2 = pneg %p1242_p12 }
  0x8a   : > { %p1250_p0 = pnand %p1249_p5, %p1243_p2 }
  0x8c   : > { %1253 = shalt.err (!%p1250_p0)
}
  0x8d   : > { %p1981_p4 = scmp.ne.s32.totalorder %s1970_s16, 0  ;;  %s1982_s22 = sshll.u32 %s1458_s30, 6 }
  0x8e   : > { %s1722_s21 = scalar_lea.hbm %s1939_s0, %s1982_s22  ;;  %s1983_s15 = sshll.u32 %s1647_s18, 2 }
  0x8f   : > { %1060 = dma.hbm_to_vmem [thread:$0]  (!%p1981_p4), %s1945_s6, 128, %s299_s17, [#allocation12]  }
  0x90   : > { %s313_s16 = scalar_lea.vmem [#allocation2], %s1983_s15  ;;  %s955_s10 = sshll.u32 %s1647_s18, 3 }
  0x91   : > { %s320_s12 = sshll.u32 %s313_s16, 4  ;;  %s310_s14 = scalar_lea.sflag [#allocation3], %s1647_s18  ;;  %s1726_s12 = int_to_ptr.vmem [resolvable:$true] %s320_s12 }
  0x92   : > { %s1254_s19 = scalar_lea.hbm %s1722_s21, 64  ;;  %s1259_s29 = scalar_lea.hbm %s1939_s0, 128 }
  0x93   : > { %p1255_p0 = scmp.ne.s32.totalorder %s1722_s21, %s1254_s19  ;;  %p1260_p13 = scmp.lt.u32.totalorder %s1722_s21, %s1939_s0 }
  0x94   : > { %p1261_p7 = scmp.lt.u32.totalorder %s1259_s29, %s1254_s19  ;;  %p1263_p9 = scmp.lt.u32.totalorder %s1254_s19, %s1722_s21 }
  0x95   : > { %p1257_p8 = pnand %p1255_p0, %p1675_p1 }
  0x96   : > { %p1262_p10 = por %p1261_p7, %p1260_p13 }
  0x97   : > { %p1258_p11 = pneg %p1257_p8 }
  0x98   : > { %p1264_p12 = por %p1263_p9, %p1262_p10 }
  0x9a   : > { %p1265_p2 = pnand %p1264_p12, %p1258_p11 }
  0x9c   : > { %1268 = shalt.err (!%p1265_p2)
}
  0x9d   : > { %s1269_s5 = scalar_lea.vmem %s1726_s12, 64  ;;  %s1466_s15 = smov [#allocation2]  }
  0x9e   : > { %p1270_p6 = scmp.ne.s32.totalorder %s1726_s12, %s1269_s5  ;;  %s1274_s16 = sshll.u32 %s1466_s15, 4  ;;  %s1275_s16 = int_to_ptr.vmem [resolvable:$false] %s1274_s16 }
  0x9f   : > { %s1276_s17 = scalar_lea.vmem %s1275_s16, 128  ;;  %p1277_p4 = scmp.lt.s32.totalorder %s1726_s12, %s1275_s16 }
  0xa0   : > { %p1272_p3 = pnand %p1270_p6, %p1675_p1  ;;  %p1278_p0 = scmp.lt.s32.totalorder %s1276_s17, %s1269_s5 }
  0xa2   : > { %p1273_p5 = pneg %p1272_p3  ;;  %p1279_p8 = por %p1278_p0, %p1277_p4 }
  0xa4   : > { %p1280_p13 = pnand %p1279_p8, %p1273_p5 }
  0xa6   : > { %1283 = shalt.err (!%p1280_p13)
}
  0xa7   : > { %p1984_p11 = scmp.ne.s32.totalorder %s1977_s26, 0  ;;  %s956_s19 = sshll.u32 %s1458_s30, 7 }
  0xa8   : > { %s1757_s22 = scalar_lea.hbm %s1941_s2, %s956_s19  ;;  %s349_s24 = scalar_lea.vmem [#allocation7], %s955_s10 }
  0xa9   : > { %1064 = dma.hbm_to_vmem [thread:$0]  (!%p1984_p11), %s1722_s21, 64, %s1726_s12, %s310_s14  }
  0xaa   : > { %s356_s5 = sshll.u32 %s349_s24, 4  ;;  %s1284_s15 = scalar_lea.hbm %s1757_s22, 128  ;;  %s357_s5 = int_to_ptr.vmem [resolvable:$true] %s356_s5 }
  0xab   : > { %p1285_p7 = scmp.ne.s32.totalorder %s1757_s22, %s1284_s15  ;;  %s1289_s14 = scalar_lea.hbm %s1941_s2, 256 }
  0xac   : > { %p1290_p12 = scmp.lt.u32.totalorder %s1757_s22, %s1941_s2  ;;  %p1291_p2 = scmp.lt.u32.totalorder %s1289_s14, %s1284_s15 }
  0xad   : > { %p1287_p10 = pnand %p1285_p7, %p1675_p1  ;;  %p1293_p3 = scmp.lt.u32.totalorder %s1284_s15, %s1757_s22 }
  0xae   : > { %p1292_p6 = por %p1291_p2, %p1290_p12 }
  0xaf   : > { %p1288_p9 = pneg %p1287_p10 }
  0xb0   : > { %p1294_p5 = por %p1293_p3, %p1292_p6 }
  0xb2   : > { %p1295_p4 = pnand %p1294_p5, %p1288_p9 }
  0xb4   : > { %1298 = shalt.err (!%p1295_p4)
}
  0xb5   : > { %s1299_s1 = scalar_lea.vmem %s357_s5, 128  ;;  %s1467_s29 = smov [#allocation7]  }
  0xb6   : > { %p1300_p0 = scmp.ne.s32.totalorder %s357_s5, %s1299_s1  ;;  %s1304_s24 = sshll.u32 %s1467_s29, 4  ;;  %s1305_s24 = int_to_ptr.vmem [resolvable:$false] %s1304_s24 }
  0xb7   : > { %s1306_s21 = scalar_lea.vmem %s1305_s24, 256  ;;  %p1307_p7 = scmp.lt.s32.totalorder %s357_s5, %s1305_s24 }
  0xb8   : > { %p1302_p8 = pnand %p1300_p0, %p1675_p1  ;;  %p1308_p10 = scmp.lt.s32.totalorder %s1306_s21, %s1299_s1 }
  0xba   : > { %p1303_p13 = pneg %p1302_p8  ;;  %p1309_p11 = por %p1308_p10, %p1307_p7 }
  0xbc   : > { %p1310_p2 = pnand %p1309_p11, %p1303_p13 }
  0xbe   : > { %1313 = shalt.err (!%p1310_p2)
}
  0xbf   : > { %p1985_p12 = scmp.ne.s32.totalorder %s1977_s26, 0  ;;  %s1784_s14 = scalar_lea.hbm %s1942_s3, %s956_s19 }
  0xc0   : > { %s367_s16 = scalar_lea.vmem [#allocation8], %s955_s10  ;;  %s1986_s1 = sand.u32 1, %s1458_s30  }
  0xc1   : > { %1070 = dma.hbm_to_vmem [thread:$0]  (!%p1985_p12), %s1757_s22, 128, %s357_s5, %s1669_s4  }
  0xc2   : > { %s374_s17 = sshll.u32 %s367_s16, 4  ;;  %s364_s29 = scalar_lea.sflag [#allocation9], %s1986_s1  ;;  %s375_s17 = int_to_ptr.vmem [resolvable:$true] %s374_s17 }
  0xc3   : > { %s1314_s24 = scalar_lea.hbm %s1784_s14, 128  ;;  %s1319_s19 = scalar_lea.hbm %s1942_s3, 256 }
  0xc4   : > { %p1315_p11 = scmp.ne.s32.totalorder %s1784_s14, %s1314_s24  ;;  %p1320_p3 = scmp.lt.u32.totalorder %s1784_s14, %s1942_s3 }
  0xc5   : > { %p1321_p5 = scmp.lt.u32.totalorder %s1319_s19, %s1314_s24  ;;  %p1323_p0 = scmp.lt.u32.totalorder %s1314_s24, %s1784_s14 }
  0xc6   : > { %p1317_p9 = pnand %p1315_p11, %p1675_p1 }
  0xc7   : > { %p1322_p4 = por %p1321_p5, %p1320_p3 }
  0xc8   : > { %p1318_p6 = pneg %p1317_p9 }
  0xc9   : > { %p1324_p8 = por %p1323_p0, %p1322_p4 }
  0xcb   : > { %p1325_p13 = pnand %p1324_p8, %p1318_p6 }
  0xcd   : > { %1328 = shalt.err (!%p1325_p13)
}
  0xce   : > { %s1329_s10 = scalar_lea.vmem %s375_s17, 128  ;;  %s1468_s21 = smov [#allocation8]  }
  0xcf   : > { %p1330_p7 = scmp.ne.s32.totalorder %s375_s17, %s1329_s10  ;;  %s1334_s15 = sshll.u32 %s1468_s21, 4  ;;  %s1335_s15 = int_to_ptr.vmem [resolvable:$false] %s1334_s15 }
  0xd0   : > { %s1336_s12 = scalar_lea.vmem %s1335_s15, 256  ;;  %p1337_p11 = scmp.lt.s32.totalorder %s375_s17, %s1335_s15 }
  0xd1   : > { %p1332_p10 = pnand %p1330_p7, %p1675_p1  ;;  %p1338_p9 = scmp.lt.s32.totalorder %s1336_s12, %s1329_s10 }
  0xd3   : > { %p1333_p2 = pneg %p1332_p10  ;;  %p1339_p12 = por %p1338_p9, %p1337_p11 }
  0xd5   : > { %p1340_p3 = pnand %p1339_p12, %p1333_p2 }
  0xd7   : > { %1343 = shalt.err (!%p1340_p3)
}
  0xd8   : > { %p1987_p5 = scmp.ne.s32.totalorder %s1977_s26, 0  ;;  %p1988_p6 = scmp.ne.s32.totalorder %s1969_s13, 0 }
  0xd9   : > { %s1810_s25 = sand.u32 (!%p1988_p6), 1, %s1450_s28   ;;  %p1989_p1 = scmp.ne.s32.totalorder (!%p1988_p6), %s1966_s11, 0 }
  0xda   : > { %1073 = dma.hbm_to_vmem [thread:$0]  (!%p1987_p5), %s1784_s14, 128, %s375_s17, %s364_s29  }
  0xdb   : > { %383 = sbr.rel (%p1988_p6) target bundleno = 830 (0x33e), region = 48  ;;  %s960_s16 = sshll.u32 (!%p1988_p6), %s1810_s25, 2 }
  0xdc   : > { %s386_s1 = scalar_lea.sflag (!%p1988_p6), [#allocation3], %s1810_s25  ;;  %s1814_s24 = scalar_lea.vmem (!%p1988_p6), [#allocation2], %s960_s16 }
  0xe2   : > { %1417 = dma.done.wait (%p1989_p1), %s386_s1, 64  }
  0xe3   : > { %1419 = vsyncadd (%p1989_p1), %s386_s1, 4294967232  ;;  %s394_s26 = sand.u32 1, %s1539_s9   ;;  %s1821_s14 = scalar_lea.vmem [#allocation5], %s960_s16 }
  0xe4   : > { %s395_s13 = scalar_lea.sflag [#allocation6], %s394_s26 }
  0xe5   : > { %1421 = dma.done.wait (%p1989_p1), %s395_s13, 192  }
  0xe6   : > { %1423 = vsyncadd (%p1989_p1), %s395_s13, 4294967104  ;;  %s1828_s17 = sshll.u32 %s1810_s25, 3  ;;  %s413_s4 = scalar_lea.sflag [#allocation9], %s394_s26 }
  0xe7   : > { %s407_s29 = scalar_lea.vmem [#allocation7], %s1828_s17  ;;  %s416_s22 = scalar_lea.vmem [#allocation8], %s1828_s17 }
  0xe8   : > { %1425 = dma.done.wait (%p1989_p1), %s413_s4, 128  }
  0xe9   : > { %1427 = vsyncadd (%p1989_p1), %s413_s4, 4294967168  ;;  %p1990_p12 = scmp.eq.s32.totalorder %s1539_s9, 0 }
  0xeb   : > { %1429 = dma.done.wait (%p1990_p12), [#allocation9], 512   ;;  %p1991_p4 = pmov %p1990_p12 }
  0xed   : > { %1431 = vsyncadd (%p1991_p4), [#allocation9], 4294966784  ;;  %p1992_p0 = pmov %p1991_p4 }
  0xef   : > { %1433 = dma.done.wait (%p1992_p0), [#allocation12], 640   ;;  %p1993_p8 = pmov %p1992_p0 }
  0xf0   : > { %v1469_v0 = vmov 0.0   ;;  %vm1470_vm0 = vmmov 0   ;;  %v1128_v1 = vld [vmem:[#allocation10] sm:$0xff]   ;;  %v1130_v3 = vld [vmem:[#allocation10 + $0x8] sm:$0xff]   ;;  %v1132_v5 = vld [vmem:[#allocation10 + $0x10] sm:$0xff]   ;;  %vm527_vm1 = vcmask 523264  }
  0xf1   : > { %1435 = vsyncadd (%p1993_p8), [#allocation12], 4294966656  ;;  %1003 = vmatprep.subr.bf16.mxu0 %v1469_v0  ;;  %1015 = vmatprep.subr.bf16.mxu1 %v1469_v0  ;;  %v1129_v2 = vld [vmem:[#allocation11] sm:$0xff]   ;;  %v1131_v4 = vld [vmem:[#allocation11 + $0x8] sm:$0xff]   ;;  %vm573_vm2 = vcmask 261120   ;;  %s989_s11 = sshll.u32 %s1539_s9, 7 }
  0xf2   : > { %1011 = vmatprep.mubr.msk.bf16.mxu0 %vm1470_vm0, %v1469_v0  ;;  %1023 = vmatprep.mubr.msk.bf16.mxu1 %vm1470_vm0, %v1469_v0  ;;  %v1133_v6 = vld [vmem:[#allocation11 + $0x10] sm:$0xff]   ;;  %v1134_v7 = vld [vmem:[#allocation10 + $0x18] sm:$0xff]   ;;  %v969_v11 = vld [vmem:[#allocation13] ss:$0 sm:$0xff]  ;;  %s480_s19 = scalar_lea.vmem [#allocation15], %s1828_s17  ;;  %s473_s18 = scalar_lea.vmem [#allocation14], %s1828_s17 }
  0xf3   : > { %1004 = vmatpush3.bf16.msra.mxu0 %v1128_v1  ;;  %1016 = vmatpush3.bf16.msra.mxu1 %v1129_v2  ;;  %v1135_v8 = vld [vmem:[#allocation11 + $0x18] sm:$0xff]   ;;  %v490_v9 = vld [vmem:[%s1814_s24] sm:$0xf]  ;;  %v977_v12 = vld [vmem:[#allocation13 + $0x1] ss:$0 sm:$0xff]  ;;  %s749_s5 = sshll.u32 %s480_s19, 4  ;;  %s1862_s12 = scalar_lea.hbm %s1947_s8, %s989_s11  ;;  %s1864_s5 = int_to_ptr.vmem [resolvable:$true] %s749_s5 }
  0xf4   : > { %1005 = vmatprep.subr.bf16.mxu0 %v1469_v0  ;;  %1017 = vmatprep.subr.bf16.mxu1 %v1469_v0  ;;  %v598_v10 = vld [vmem:[%s1821_s14] sm:$0xf]  ;;  %v571_v14 = vld [vmem:[%s407_s29] sm:$0xff]  ;;  %s736_s10 = sshll.u32 %s473_s18, 4  ;;  %s1869_s1 = scalar_lea.hbm %s1946_s7, %s989_s11  ;;  %s1871_s10 = int_to_ptr.vmem [resolvable:$true] %s736_s10 }
  0xf5   : > { %v678_v18 = vld [vmem:[%s416_s22] sm:$0xff]  ;;  %v975_v46 = vld [vmem:[#allocation13 + $0x2] ss:$0 sm:$0xff]  ;;  %v976_v48 = vld [vmem:[#allocation13 + $0x3] ss:$0 sm:$0xff]  ;;  %s723_s24 = scalar_lea.sflag [#allocation16], %s1810_s25 }
  0xf6   : > { %v983_v51 = vld [vmem:[#allocation13 + $0x4] ss:$0 sm:$0xff]  ;;  %v984_v54 = vld [vmem:[#allocation13 + $0x5] ss:$0 sm:$0xff]  ;;  %v986_v55 = vld [vmem:[#allocation13 + $0x6] ss:$0 sm:$0xff] }
  0xf7   : > { %1006 = vmatpush3.bf16.msra.mxu0 %v1130_v3  ;;  %1018 = vmatpush3.bf16.msra.mxu1 %v1131_v4  ;;  %v985_v57 = vld [vmem:[#allocation13 + $0x7] ss:$0 sm:$0xff]  ;;  %s1344_s26 = scalar_lea.vmem %s1864_s5, 128  ;;  %p1994_p7 = scmp.ne.s32.totalorder %s1975_s23, 0 }
  0xf8   : > { %1007 = vmatprep.subr.bf16.mxu0 %v1469_v0  ;;  %1019 = vmatprep.subr.bf16.mxu1 %v1469_v0  ;;  %p1345_p13 = scmp.ne.s32.totalorder %s1864_s5, %s1344_s26  ;;  %s1471_s13 = smov [#allocation15]  }
  0xf9   : > { %s1348_s14 = sshll.u32 %s1471_s13, 4  ;;  %s1349_s14 = int_to_ptr.vmem [resolvable:$false] %s1348_s14 }
  0xfa   : > { %p1346_p10 = pnand %p1345_p13, %p1994_p7  ;;  %s1350_s29 = scalar_lea.vmem %s1349_s14, 256 }
  0xfb   : > { %1008 = vmatpush3.bf16.msra.mxu0 %v1132_v5  ;;  %1020 = vmatpush3.bf16.msra.mxu1 %v1133_v6  ;;  %p1351_p11 = scmp.lt.s32.totalorder %s1864_s5, %s1349_s14  ;;  %p1352_p9 = scmp.lt.s32.totalorder %s1350_s29, %s1344_s26 }
  0xfc   : > { %1009 = vmatprep.subr.bf16.mxu0 %v1469_v0  ;;  %1021 = vmatprep.subr.bf16.mxu1 %v1469_v0  ;;  %p1347_p2 = pneg %p1346_p10 }
  0xfd   : > { %p1353_p3 = por %p1352_p9, %p1351_p11 }
  0xff   : > { %1010 = vmatpush3.bf16.msra.mxu0 %v1134_v7  ;;  %1022 = vmatpush3.bf16.msra.mxu1 %v1135_v8  ;;  %p1354_p5 = pnand %p1353_p3, %p1347_p2 }
 0x102   : > { %1012 = vmatmul.mubr.msk.bf16.vlgmr.msra.gmra.mrb[0].mxu0 %vm527_vm1, %v490_v9  ;;  %1024 = vmatmul.mubr.msk.bf16.vlgmr.msra.gmra.mrb[0].mxu1 %vm527_vm1, %v598_v10 }
 0x1d5   : > { %v565_v13 = vpop.f32.mrb[0].mxu0  ;;  %v672_v17 = vpop.f32.mrb[0].mxu1 }
 0x1d6   : > { %v566_v15 = vadd.f32 %v969_v11, %v565_v13  ;;  %v1013_v16 = vpop.f32.mrb[1].mxu0  ;;  %v673_v19 = vadd.f32 %v977_v12, %v672_v17  ;;  %v1025_v21 = vpop.f32.mrb[1].mxu1 }
 0x1d7   : > { %v568_v20 = vpop.f32.mrb[2].mxu0  ;;  %v675_v23 = vpop.f32.mrb[2].mxu1 }
 0x1d8   : > { %v1014_v22 = vpop.f32.mrb[3].mxu0  ;;  %v572_v24 = vadd.f32 %v571_v14, %v566_v15  ;;  %v1026_v25 = vpop.f32.mrb[3].mxu1  ;;  %v679_v26 = vadd.f32 %v678_v18, %v673_v19 }
 0x1da   : > { %v574_v27 = vsel %vm573_vm2, %v572_v24, 0.0  ;;  %v680_v28 = vsel %vm573_vm2, %v679_v26, 0.0 }
 0x1db   : > { %575 = vadd.xlane.f32.xlu0 %v574_v27 }
 0x1df   : > { %681 = vadd.xlane.f32.xlu0 %v680_v28 }
 0x268   : > { %v576_v29 = vpop.xlane.xlu0 %575 }
 0x269   : > { %v578_v30 = vmul.f32 0.03125, %v576_v29 }
 0x26b   : > { %v579_v31 = vsub.f32 %v572_v24, %v578_v30 }
 0x26c   : > { %v682_v32 = vpop.xlane.xlu0 %681 }
 0x26d   : > { %v683_v33 = vmul.f32 0.03125, %v682_v32  ;;  %v580_v34 = vmul.f32 %v579_v31, %v579_v31 }
 0x26f   : > { %v684_v35 = vsub.f32 %v679_v26, %v683_v33  ;;  %v581_v36 = vsel %vm573_vm2, %v580_v34, 0.0 }
 0x270   : > { %582 = vadd.xlane.f32.xlu1 %v581_v36 }
 0x271   : > { %v685_v37 = vmul.f32 %v684_v35, %v684_v35 }
 0x273   : > { %v686_v38 = vsel %vm573_vm2, %v685_v37, 0.0 }
 0x274   : > { %687 = vadd.xlane.f32.xlu1 %v686_v38 }
 0x2fd   : > { %v583_v39 = vpop.xlane.xlu1 %582 }
 0x2fe   : > { %v584_v40 = vmul.f32 0.03125, %v583_v39 }
 0x300   : > { %v585_v41 = vadd.f32 1e-12, %v584_v40 }
 0x301   : > { %v688_v42 = vpop.xlane.xlu1 %687 }
 0x302   : > { %1136 = vrsqrt.f32 %v585_v41  ;;  %v689_v43 = vmul.f32 0.03125, %v688_v42 }
 0x304   : > { %v690_v44 = vadd.f32 1e-12, %v689_v43 }
 0x306   : > { %1138 = vrsqrt.f32 %v690_v44 }
 0x30c   : > { %v1137_v45 = vpop.eup %1136 }
 0x30d   : > { %v587_v47 = vmul.f32 %v1137_v45, %v579_v31 }
 0x30f   : > { %v592_v49 = vmul.f32 %v975_v46, %v587_v47 }
 0x310   : > { %v1139_v50 = vpop.eup %1138 }
 0x311   : > { %v692_v52 = vmul.f32 %v1139_v50, %v684_v35  ;;  %v597_v53 = vadd.f32 %v976_v48, %v592_v49 }
 0x313   : > { %v697_v56 = vmul.f32 %v983_v51, %v692_v52  ;;  %v714_v59 = vmul.f32 %v986_v55, %v597_v53 }
 0x315   : > { %v702_v58 = vadd.f32 %v984_v54, %v697_v56 }
 0x317   : > { %v707_v60 = vmul.f32 %v985_v57, %v702_v58  ;;  %v715_v61 = vadd.f32 %v714_v59, %v702_v58 }
 0x319   : > { %v708_v62 = vadd.f32 %v707_v60, %v597_v53  ;;  %716 = vst.msk [vmem:[%s480_s19] sm:$0xff] %vm573_vm2, %v715_v61 }
 0x31a   : > { %1357 = shalt.err (!%p1354_p5)
}
 0x31b   : > { %s1358_s4 = scalar_lea.hbm %s1862_s12, 128  ;;  %s1362_s19 = scalar_lea.hbm %s1947_s8, 256 }
 0x31c   : > { %p1359_p6 = scmp.ne.s32.totalorder %s1862_s12, %s1358_s4  ;;  %p1363_p4 = scmp.lt.u32.totalorder %s1862_s12, %s1947_s8 }
 0x31d   : > { %p1364_p0 = scmp.lt.u32.totalorder %s1362_s19, %s1358_s4  ;;  %p1366_p13 = scmp.lt.u32.totalorder %s1358_s4, %s1862_s12 }
 0x31e   : > { %p1360_p1 = pnand %p1359_p6, %p1994_p7 }
 0x31f   : > { %p1365_p8 = por %p1364_p0, %p1363_p4 }
 0x320   : > { %p1361_p12 = pneg %p1360_p1 }
 0x321   : > { %p1367_p10 = por %p1366_p13, %p1365_p8 }
 0x323   : > { %p1368_p2 = pnand %p1367_p10, %p1361_p12 }
 0x325   : > { %1371 = shalt.err (!%p1368_p2)
}
 0x326   : > { %1048 = dma.vmem_to_hbm [thread:$0]  (%p1994_p7), %s1864_s5, 128, %s1862_s12, %s723_s24   ;;  %709 = vst.msk [vmem:[%s473_s18] sm:$0xff] %vm573_vm2, %v708_v62 }
 0x327   : > { %s718_s9 = scalar_lea.sflag [#allocation4], %s1810_s25  ;;  %s1372_s16 = scalar_lea.vmem %s1871_s10, 128 }
 0x328   : > { %p1373_p11 = scmp.ne.s32.totalorder %s1871_s10, %s1372_s16  ;;  %s1472_s26 = smov [#allocation14]  }
 0x329   : > { %s1376_s13 = sshll.u32 %s1472_s26, 4  ;;  %s1377_s13 = int_to_ptr.vmem [resolvable:$false] %s1376_s13 }
 0x32a   : > { %p1374_p9 = pnand %p1373_p11, %p1994_p7  ;;  %s1378_s14 = scalar_lea.vmem %s1377_s13, 256 }
 0x32b   : > { %p1379_p5 = scmp.lt.s32.totalorder %s1871_s10, %s1377_s13  ;;  %p1380_p6 = scmp.lt.s32.totalorder %s1378_s14, %s1372_s16 }
 0x32c   : > { %p1375_p3 = pneg %p1374_p9 }
 0x32d   : > { %p1381_p1 = por %p1380_p6, %p1379_p5 }
 0x32f   : > { %p1382_p12 = pnand %p1381_p1, %p1375_p3 }
 0x331   : > { %1385 = shalt.err (!%p1382_p12)
}
 0x332   : > { %s1386_s25 = scalar_lea.hbm %s1869_s1, 128  ;;  %s1390_s18 = scalar_lea.hbm %s1946_s7, 256 }
 0x333   : > { %p1387_p4 = scmp.ne.s32.totalorder %s1869_s1, %s1386_s25  ;;  %p1391_p13 = scmp.lt.u32.totalorder %s1869_s1, %s1946_s7 }
 0x334   : > { %p1392_p10 = scmp.lt.u32.totalorder %s1390_s18, %s1386_s25  ;;  %p1394_p11 = scmp.lt.u32.totalorder %s1386_s25, %s1869_s1 }
 0x335   : > { %p1388_p0 = pnand %p1387_p4, %p1994_p7 }
 0x336   : > { %p1393_p2 = por %p1392_p10, %p1391_p13 }
 0x337   : > { %p1389_p8 = pneg %p1388_p0 }
 0x338   : > { %p1395_p9 = por %p1394_p11, %p1393_p2 }
 0x33a   : > { %p1396_p3 = pnand %p1395_p9, %p1389_p8 }
 0x33c   : > { %1399 = shalt.err (!%p1396_p3)
}
 0x33d   : > { %1047 = dma.vmem_to_hbm [thread:$0]  (%p1994_p7), %s1871_s10, 128, %s1869_s1, %s718_s9  }
 0x33e PF: > { %s1995_s29 = sld [smem:[#allocation25_spill]]  ;;  %s761_s4 = sand.u32 1, %s1446_s27  }
 0x33f   : > { %p1997_p6 = scmp.ge.s32.totalorder %s1458_s30, 2  ;;  %s762_s22 = scalar_lea.sflag [#allocation4], %s761_s4 }
 0x344   : > { %p1996_p5 = scmp.ne.s32.totalorder %s1995_s29, 0 }
 0x346   : > { %p1075_p1 = pnand %p1997_p6, %p1996_p5 }
 0x348   : > { %1437 = dma.done.wait (!%p1075_p1), %s762_s22, 128  }
 0x349   : > { %1439 = vsyncadd (!%p1075_p1), %s762_s22, 4294967168  ;;  %s771_s11 = scalar_lea.sflag [#allocation16], %s761_s4 }
 0x34a   : > { %1441 = dma.done.wait (!%p1075_p1), %s771_s11, 128  }
 0x34b   : > { %1443 = vsyncadd (!%p1075_p1), %s771_s11, 4294967168  ;;  %s1998_s23 = sld [smem:[#allocation24_spill]]  ;;  %s1999_s29 = sld [smem:[#allocation26_spill]] }
 0x34c   : > { %p32_p7 = scmp.ge.s32.totalorder %s1628_s20, 4   ;;  %s2000_s27 = smov %s1450_s28 }
 0x34d   : > { %s2002_s30 = smov %s1628_s20 }
 0x34e   :  { %34 = sbr.rel (!%p32_p7) target bundleno = 16 (0x10), region = 159 }
 0x351   : > { %s2001_s28 = smov %s1998_s23 }
 0x355   :  { %776 = vsyncpa [#allocation3], 1 }
 0x356   :  { %778 = vsyncpa [#allocation3 + $0x1], 1 }
 0x357   :  { %779 = vsyncpa [#allocation6], 1 }
 0x358   :  { %781 = vsyncpa [#allocation6 + $0x1], 1 }
 0x359   :  { %782 = vsyncpa [#allocation9], 1 }
 0x35a   :  { %784 = vsyncpa [#allocation9 + $0x1], 1 }
 0x35b   :  { %785 = vsyncpa [#allocation12], 1 }
 0x35c   :  { %786 = vsyncpa [#allocation4], 1 }
 0x35d   :  { %788 = vsyncpa [#allocation4 + $0x1], 1 }
 0x35e   :  { %789 = vsyncpa [#allocation16], 1 }
 0x35f   :  { %791 = vsyncpa [#allocation16 + $0x1], 1 }

</bundles_post_ra>
